<compile_context>
chip_gen: v6e
topology: v6e:2x2x1
jax: 0.10.0
libtpu: 0.0.40
codegen_flags: <defaults>
</compile_context>

<pallas_src>
import math

import jax
import jax.numpy as jnp
from jax.experimental import pallas as pl
from jax.experimental.pallas import tpu as pltpu

_LANE = 128


def _round_up(x, m):
    return (x + m - 1) // m * m


def _vmem_limits():
    """Generation-aware scoped-VMEM limit, sizing budget and row-tile cap."""
    cap = None
    try:
        cap = getattr(pltpu.get_tpu_info(), "vmem_capacity_bytes", None)
    except Exception:
        cap = None
    if not cap or cap <= 0:
        cap = 64 << 20                          # conservative: v7x 64 MiB / TC
    # Leave headroom for Mosaic internal scratch / semaphores.
    limit = max(32 << 20, min(cap - (12 << 20), 100 << 20))
    budget = limit - (6 << 20)
    row_cap = 1024 if cap >= (96 << 20) else 512
    return limit, budget, row_cap


def _choose_tm(n_rows, h, in_itemsize, w_itemsize, budget, row_cap, row_align,
               weight_buffers):
    """Largest sublane-aligned row tile that fits the VMEM sizing budget."""
    weight_bytes = weight_buffers * (h * h + 2 * h) * w_itemsize
    # x1/x2/out streams are double-buffered by the pipeline; the body holds
    # ~10 f32-equivalent rows of intermediates (h1/h2, tanh, casts, blend).
    per_row = 3 * 2 * h * in_itemsize + 10 * h * 4
    avail = budget - weight_bytes
    if avail < per_row * row_align:
        # TODO(synk): K-tile W1 (contraction-axis grid + f32 accumulator
        # scratch) for very large H instead of collapsing to the minimum tile.
        tm = row_align
    else:
        tm = min(row_cap, avail // per_row)
    tm = min(int(tm), n_rows)
    tm = max(row_align, tm - tm % row_align)
    return tm


def _make_kernel(compute_dtype):
    def kernel(x1_ref, x2_ref, w1_ref, b1_ref, w2_ref, o_ref):
        """x1/x2/o: (TM, H) tiles; w1: (H, H); b1, w2: (1, H) lane rows."""
        w1 = w1_ref[...]
        # Two dots against the same resident W1 (no concatenate copy); f32 acc.
        h1 = jnp.dot(x1_ref[...], w1, preferred_element_type=jnp.float32)
        h2 = jnp.dot(x2_ref[...], w1, preferred_element_type=jnp.float32)
        b1 = b1_ref[...].astype(jnp.float32)
        t1 = jnp.tanh((h1 + b1).astype(compute_dtype))
        t2 = jnp.tanh((h2 + b1).astype(compute_dtype))

        # (H -> 1) score projection: VPU multiply + lane reduce, f32 accumulate.
        w2 = w2_ref[...].astype(compute_dtype)
        s1 = jnp.sum((t1 * w2).astype(jnp.float32), axis=-1, keepdims=True)
        s2 = jnp.sum((t2 * w2).astype(jnp.float32), axis=-1, keepdims=True)

        # 2-way softmax over the stacked inputs == sigmoid of the score diff
        # (b2 shifts both logits equally and cancels exactly).
        a1 = jax.nn.sigmoid(s1 - s2).astype(compute_dtype)

        x1 = x1_ref[...].astype(compute_dtype)
        x2 = x2_ref[...].astype(compute_dtype)
        o_ref[...] = (x2 + a1 * (x1 - x2)).astype(o_ref.dtype)

    return kernel


def gated_fusion(x1, x2, w1, b1, w2, b2=None, *, tm=None):
    """GatedFusion forward.  x1, x2: (..., H) -> (..., H).

    w1 is stored (in, out) so the kernel computes x @ w1 (== x @ W_pt.T).
    b2 is accepted for API parity but unused: it cancels in the 2-way softmax.
    """
    del b2
    assert x1.shape == x2.shape and x1.dtype == x2.dtype
    H = x1.shape[-1]
    lead = x1.shape[:-1]
    N = math.prod(lead) if lead else 1

    x1f = x1.reshape(N, H)
    x2f = x2.reshape(N, H)
    w1c = w1.astype(x1.dtype)

    # Lane-dense feature dim: pad H to a multiple of 128.  Zero padding is
    # exact (padded W1 rows/cols, b1 and w2 entries are zero -> padded output
    # columns are zero and get sliced off).
    Hp = _round_up(H, _LANE)
    if Hp != H:
        x1f = jnp.pad(x1f, ((0, 0), (0, Hp - H)))
        x2f = jnp.pad(x2f, ((0, 0), (0, Hp - H)))
        w1p = jnp.pad(w1c, ((0, Hp - H), (0, Hp - H)))
        b1_row = jnp.pad(b1.reshape(1, H), ((0, 0), (0, Hp - H)))
        w2_row = jnp.pad(w2.reshape(1, H), ((0, 0), (0, Hp - H)))
    else:
        w1p = w1c
        b1_row = b1.reshape(1, H)
        w2_row = w2.reshape(1, H)

    row_align = 16 if x1.dtype.itemsize < 4 else 8
    n_aligned = _round_up(N, row_align)

    limit, budget, row_cap = _vmem_limits()
    # bf16 tanh / blend on bf16 inputs (v6e/v7x bf16 VPU/EUP); f32 otherwise.
    compute_dtype = jnp.bfloat16 if x1.dtype == jnp.bfloat16 else jnp.float32
    kernel = _make_kernel(compute_dtype)

    out = None
    for single_buf in (True, False):
        tm_i = tm
        if tm_i is None:
            tm_i = _choose_tm(n_aligned, Hp, x1.dtype.itemsize,
                              w1p.dtype.itemsize, budget, row_cap, row_align,
                              1 if single_buf else 2)
        tm_i = max(row_align, min(int(tm_i), n_aligned))
        tm_i -= tm_i % row_align
        tm_i = max(row_align, tm_i)
        # Guarantee >= 2 grid steps when there is enough work so both v7x
        # TensorCores get a "parallel" step.
        if n_aligned >= 2 * row_align:
            half = _round_up(-(-n_aligned // 2), row_align)
            tm_i = min(tm_i, half)

        np_rows = _round_up(N, tm_i)
        x1p = jnp.pad(x1f, ((0, np_rows - N), (0, 0))) if np_rows != N else x1f
        x2p = jnp.pad(x2f, ((0, np_rows - N), (0, 0))) if np_rows != N else x2f

        def row_spec():
            return pl.BlockSpec((tm_i, Hp), lambda i: (i, 0))

        def inv_spec(shape):
            idx = lambda i: (0,) * len(shape)
            if single_buf:
                try:
                    return pl.BlockSpec(shape, idx, pipeline_mode=pl.Buffered(1))
                except Exception:
                    return pl.BlockSpec(shape, idx)
            return pl.BlockSpec(shape, idx)

        try:
            out = pl.pallas_call(
                kernel,
                out_shape=jax.ShapeDtypeStruct((np_rows, Hp), x1.dtype),
                grid_spec=pltpu.PrefetchScalarGridSpec(
                    num_scalar_prefetch=0,
                    grid=(pl.cdiv(np_rows, tm_i),),
                    in_specs=[
                        row_spec(),                 # x1 rows
                        row_spec(),                 # x2 rows
                        inv_spec((Hp, Hp)),         # W1 (grid-invariant)
                        inv_spec((1, Hp)),          # b1
                        inv_spec((1, Hp)),          # w2 as a lane row
                    ],
                    out_specs=row_spec(),
                ),
                compiler_params=pltpu.CompilerParams(
                    dimension_semantics=("parallel",),
                    vmem_limit_bytes=limit,
                ),
            )(x1p, x2p, w1p, b1_row, w2_row)
            out = jax.block_until_ready(out)
            break
        except Exception:
            if not single_buf:
                raise
            # Fall back to default double-buffered specs.
            out = None

    out = out[:N, :H]
    return out.reshape(*lead, H)


def gated_fusion_ref(x1, x2, w1, b1, w2, b2):
    """Pure-JAX reference matching the PyTorch forward (includes b2)."""
    x = jnp.stack([x1, x2], axis=0)                             # (2, ..., H)
    h = jnp.tanh(jnp.einsum("...h,hk->...k", x, w1) + b1)       # (2, ..., H)
    s = jnp.einsum("...h,hk->...k", h, w2) + b2                 # (2, ..., 1)
    score = jax.nn.softmax(s, axis=0)
    return jnp.sum(score * x, axis=0)


if __name__ == "__main__":
    key = jax.random.PRNGKey(0)
    batch, seq, hidden = 2, 8, 32
    k1, k2, kw1, kb1, kw2, kb2 = jax.random.split(key, 6)

    x1 = jax.random.normal(k1, (batch, seq, hidden), dtype=jnp.float32)
    x2 = jax.random.normal(k2, (batch, seq, hidden), dtype=jnp.float32)

    # Deterministic parameter init (PyTorch Linear(H,H) and Linear(H,1)),
    # stored (in, out) so the kernel does x @ W directly (== x @ W_pt.T).
    scale1 = 1.0 / jnp.sqrt(hidden)
    w1 = jax.random.uniform(kw1, (hidden, hidden), jnp.float32, -scale1, scale1)
    b1 = jax.random.uniform(kb1, (hidden,), jnp.float32, -scale1, scale1)
    w2 = jax.random.uniform(kw2, (hidden, 1), jnp.float32, -scale1, scale1)
    b2 = jax.random.uniform(kb2, (1,), jnp.float32, -scale1, scale1)

    # f32 path.
    out = jax.block_until_ready(gated_fusion(x1, x2, w1, b1, w2, b2))
    ref = gated_fusion_ref(x1, x2, w1, b1, w2, b2)
    assert out.shape == (batch, seq, hidden)
    assert jnp.allclose(out, ref, atol=1e-5, rtol=1e-5), "f32 mismatch vs reference"

    # bf16 fast path (MXU-native inputs, bf16 tanh/blend) — looser tolerance.
    x1b, x2b = x1.astype(jnp.bfloat16), x2.astype(jnp.bfloat16)
    w1b, b1b, w2b = (w1.astype(jnp.bfloat16), b1.astype(jnp.bfloat16),
                     w2.astype(jnp.bfloat16))
    outb = jax.block_until_ready(gated_fusion(x1b, x2b, w1b, b1b, w2b, b2))
    refb = gated_fusion_ref(x1b.astype(jnp.float32), x2b.astype(jnp.float32),
                            w1b.astype(jnp.float32), b1b.astype(jnp.float32),
                            w2b.astype(jnp.float32), b2)
    assert outb.dtype == jnp.bfloat16
    assert jnp.allclose(outb.astype(jnp.float32), refb, atol=1e-1, rtol=1e-1), \
        "bf16 mismatch vs reference"

    print("KERNEL_OK")
</pallas_src>

<mosaic_0001>
module attributes {stable_mosaic.version = 11 : i64} {
  func.func @kernel(%arg0: i32, %arg1: memref<8x128xf32, #tpu.memory_space<vmem>>, %arg2: memref<8x128xf32, #tpu.memory_space<vmem>>, %arg3: memref<128x128xf32, #tpu.memory_space<vmem>>, %arg4: memref<1x128xf32, #tpu.memory_space<vmem>>, %arg5: memref<1x128xf32, #tpu.memory_space<vmem>>, %arg6: memref<8x128xf32, #tpu.memory_space<vmem>>) attributes {dimension_semantics = [#tpu.dimension_semantics<parallel>], iteration_bounds = array<i64: 2>, scalar_prefetch = 0 : i64, scratch_operands = 0 : i64, tpu.core_type = #tpu.core_type<tc>, window_params = [{transform_indices = @transform_0, window_bounds = array<i64: 8, 128>}, {transform_indices = @transform_1, window_bounds = array<i64: 8, 128>}, {pipeline_mode = #tpu.pipeline_mode<synchronous>, transform_indices = @transform_2, window_bounds = array<i64: 128, 128>}, {pipeline_mode = #tpu.pipeline_mode<synchronous>, transform_indices = @transform_3, window_bounds = array<i64: 1, 128>}, {pipeline_mode = #tpu.pipeline_mode<synchronous>, transform_indices = @transform_4, window_bounds = array<i64: 1, 128>}, {transform_indices = @transform_5, window_bounds = array<i64: 8, 128>}]} {
    %c0 = arith.constant 0 : index
    %c0_0 = arith.constant 0 : index
    %0 = vector.load %arg3[%c0, %c0_0] : memref<128x128xf32, #tpu.memory_space<vmem>>, vector<128x128xf32>
    %c0_1 = arith.constant 0 : index
    %c0_2 = arith.constant 0 : index
    %1 = vector.load %arg1[%c0_1, %c0_2] : memref<8x128xf32, #tpu.memory_space<vmem>>, vector<8x128xf32>
    %cst = arith.constant dense<0.000000e+00> : vector<8x128xf32>
    %2 = tpu.matmul %1, %0, %cst {dimension_numbers = #tpu.dot_dimension_numbers<[1], [0], [0], [1], [0, 0, 1, 1], [], []>} : vector<8x128xf32>, vector<128x128xf32>, vector<8x128xf32> -> vector<8x128xf32>
    %c0_3 = arith.constant 0 : index
    %c0_4 = arith.constant 0 : index
    %3 = vector.load %arg2[%c0_3, %c0_4] : memref<8x128xf32, #tpu.memory_space<vmem>>, vector<8x128xf32>
    %cst_5 = arith.constant dense<0.000000e+00> : vector<8x128xf32>
    %4 = tpu.matmul %3, %0, %cst_5 {dimension_numbers = #tpu.dot_dimension_numbers<[1], [0], [0], [1], [0, 0, 1, 1], [], []>} : vector<8x128xf32>, vector<128x128xf32>, vector<8x128xf32> -> vector<8x128xf32>
    %c0_6 = arith.constant 0 : index
    %c0_7 = arith.constant 0 : index
    %5 = vector.load %arg4[%c0_6, %c0_7] : memref<1x128xf32, #tpu.memory_space<vmem>>, vector<1x128xf32>
    %6 = vector.broadcast %5 : vector<1x128xf32> to vector<8x128xf32>
    %7 = arith.addf %2, %6 : vector<8x128xf32>
    %8 = math.tanh %7 : vector<8x128xf32>
    %9 = vector.broadcast %5 : vector<1x128xf32> to vector<8x128xf32>
    %10 = arith.addf %4, %9 : vector<8x128xf32>
    %11 = math.tanh %10 : vector<8x128xf32>
    %c0_8 = arith.constant 0 : index
    %c0_9 = arith.constant 0 : index
    %12 = vector.load %arg5[%c0_8, %c0_9] : memref<1x128xf32, #tpu.memory_space<vmem>>, vector<1x128xf32>
    %13 = vector.broadcast %12 : vector<1x128xf32> to vector<8x128xf32>
    %14 = arith.mulf %8, %13 : vector<8x128xf32>
    %cst_10 = arith.constant dense<0.000000e+00> : vector<8xf32>
    %15 = vector.multi_reduction <add>, %14, %cst_10 [1] : vector<8x128xf32> to vector<8xf32>
    %16 = vector.shape_cast %15 : vector<8xf32> to vector<8x1xf32>
    %17 = vector.broadcast %12 : vector<1x128xf32> to vector<8x128xf32>
    %18 = arith.mulf %11, %17 : vector<8x128xf32>
    %cst_11 = arith.constant dense<0.000000e+00> : vector<8xf32>
    %19 = vector.multi_reduction <add>, %18, %cst_11 [1] : vector<8x128xf32> to vector<8xf32>
    %20 = vector.shape_cast %19 : vector<8xf32> to vector<8x1xf32>
    %21 = arith.subf %16, %20 : vector<8x1xf32>
    %22 = arith.negf %21 : vector<8x1xf32>
    %23 = math.exp %22 : vector<8x1xf32>
    %cst_12 = arith.constant 1.000000e+00 : f32
    %24 = vector.broadcast %cst_12 : f32 to vector<8x1xf32>
    %25 = arith.addf %24, %23 : vector<8x1xf32>
    %26 = arith.divf %24, %25 : vector<8x1xf32>
    %c0_13 = arith.constant 0 : index
    %c0_14 = arith.constant 0 : index
    %27 = vector.load %arg1[%c0_13, %c0_14] : memref<8x128xf32, #tpu.memory_space<vmem>>, vector<8x128xf32>
    %c0_15 = arith.constant 0 : index
    %c0_16 = arith.constant 0 : index
    %28 = vector.load %arg2[%c0_15, %c0_16] : memref<8x128xf32, #tpu.memory_space<vmem>>, vector<8x128xf32>
    %29 = arith.subf %27, %28 : vector<8x128xf32>
    %30 = vector.broadcast %26 : vector<8x1xf32> to vector<8x128xf32>
    %31 = arith.mulf %30, %29 : vector<8x128xf32>
    %32 = arith.addf %28, %31 : vector<8x128xf32>
    %c0_17 = arith.constant 0 : index
    %c0_18 = arith.constant 0 : index
    %33 = vector.load %arg6[%c0_17, %c0_18] : memref<8x128xf32, #tpu.memory_space<vmem>>, vector<8x128xf32>
    tpu.vector_store %arg6[%c0_17, %c0_18], %32 {strides = array<i32>} : memref<8x128xf32, #tpu.memory_space<vmem>>, vector<8x128xf32>,
    return
  }
  func.func @transform_0(%arg0: i32) -> (i32, i32) {
    %c0_i32 = arith.constant 0 : i32
    %c0_i32_0 = arith.constant 0 : i32
    return %arg0, %c0_i32 : i32, i32
  }
  func.func @transform_1(%arg0: i32) -> (i32, i32) {
    %c0_i32 = arith.constant 0 : i32
    %c0_i32_0 = arith.constant 0 : i32
    return %arg0, %c0_i32 : i32, i32
  }
  func.func @transform_2(%arg0: i32) -> (i32, i32) {
    %c0_i32 = arith.constant 0 : i32
    %c0_i32_0 = arith.constant 0 : i32
    %c0_i32_1 = arith.constant 0 : i32
    return %c0_i32, %c0_i32_0 : i32, i32
  }
  func.func @transform_3(%arg0: i32) -> (i32, i32) {
    %c0_i32 = arith.constant 0 : i32
    %c0_i32_0 = arith.constant 0 : i32
    %c0_i32_1 = arith.constant 0 : i32
    return %c0_i32, %c0_i32_0 : i32, i32
  }
  func.func @transform_4(%arg0: i32) -> (i32, i32) {
    %c0_i32 = arith.constant 0 : i32
    %c0_i32_0 = arith.constant 0 : i32
    %c0_i32_1 = arith.constant 0 : i32
    return %c0_i32, %c0_i32_0 : i32, i32
  }
  func.func @transform_5(%arg0: i32) -> (i32, i32) {
    %c0_i32 = arith.constant 0 : i32
    %c0_i32_0 = arith.constant 0 : i32
    return %arg0, %c0_i32 : i32, i32
  }
}

module attributes {stable_mosaic.version = 11 : i64} {
  func.func @kernel(%arg0: i32, %arg1: memref<8x128xf32, #tpu.memory_space<vmem>>, %arg2: memref<8x128xf32, #tpu.memory_space<vmem>>, %arg3: memref<128x128xf32, #tpu.memory_space<vmem>>, %arg4: memref<1x128xf32, #tpu.memory_space<vmem>>, %arg5: memref<1x128xf32, #tpu.memory_space<vmem>>, %arg6: memref<8x128xf32, #tpu.memory_space<vmem>>) attributes {dimension_semantics = [#tpu.dimension_semantics<parallel>], iteration_bounds = array<i64: 2>, scalar_prefetch = 0 : i64, scratch_operands = 0 : i64, tpu.core_type = #tpu.core_type<tc>, window_params = [{transform_indices = @transform_0, window_bounds = array<i64: 8, 128>}, {transform_indices = @transform_1, window_bounds = array<i64: 8, 128>}, {pipeline_mode = #tpu.pipeline_mode<synchronous>, transform_indices = @transform_2, window_bounds = array<i64: 128, 128>}, {pipeline_mode = #tpu.pipeline_mode<synchronous>, transform_indices = @transform_3, window_bounds = array<i64: 1, 128>}, {pipeline_mode = #tpu.pipeline_mode<synchronous>, transform_indices = @transform_4, window_bounds = array<i64: 1, 128>}, {transform_indices = @transform_5, window_bounds = array<i64: 8, 128>}]} {
    %c0 = arith.constant 0 : index
    %c0_0 = arith.constant 0 : index
    %0 = vector.load %arg3[%c0, %c0_0] : memref<128x128xf32, #tpu.memory_space<vmem>>, vector<128x128xf32>
    %c0_1 = arith.constant 0 : index
    %c0_2 = arith.constant 0 : index
    %1 = vector.load %arg1[%c0_1, %c0_2] : memref<8x128xf32, #tpu.memory_space<vmem>>, vector<8x128xf32>
    %cst = arith.constant dense<0.000000e+00> : vector<8x128xf32>
    %2 = tpu.matmul %1, %0, %cst {dimension_numbers = #tpu.dot_dimension_numbers<[1], [0], [0], [1], [0, 0, 1, 1], [], []>} : vector<8x128xf32>, vector<128x128xf32>, vector<8x128xf32> -> vector<8x128xf32>
    %c0_3 = arith.constant 0 : index
    %c0_4 = arith.constant 0 : index
    %3 = vector.load %arg2[%c0_3, %c0_4] : memref<8x128xf32, #tpu.memory_space<vmem>>, vector<8x128xf32>
    %cst_5 = arith.constant dense<0.000000e+00> : vector<8x128xf32>
    %4 = tpu.matmul %3, %0, %cst_5 {dimension_numbers = #tpu.dot_dimension_numbers<[1], [0], [0], [1], [0, 0, 1, 1], [], []>} : vector<8x128xf32>, vector<128x128xf32>, vector<8x128xf32> -> vector<8x128xf32>
    %c0_6 = arith.constant 0 : index
    %c0_7 = arith.constant 0 : index
    %5 = vector.load %arg4[%c0_6, %c0_7] : memref<1x128xf32, #tpu.memory_space<vmem>>, vector<1x128xf32>
    %6 = vector.broadcast %5 : vector<1x128xf32> to vector<8x128xf32>
    %7 = arith.addf %2, %6 : vector<8x128xf32>
    %8 = math.tanh %7 : vector<8x128xf32>
    %9 = vector.broadcast %5 : vector<1x128xf32> to vector<8x128xf32>
    %10 = arith.addf %4, %9 : vector<8x128xf32>
    %11 = math.tanh %10 : vector<8x128xf32>
    %c0_8 = arith.constant 0 : index
    %c0_9 = arith.constant 0 : index
    %12 = vector.load %arg5[%c0_8, %c0_9] : memref<1x128xf32, #tpu.memory_space<vmem>>, vector<1x128xf32>
    %13 = vector.broadcast %12 : vector<1x128xf32> to vector<8x128xf32>
    %14 = arith.mulf %8, %13 : vector<8x128xf32>
    %cst_10 = arith.constant dense<0.000000e+00> : vector<8xf32>
    %15 = vector.multi_reduction <add>, %14, %cst_10 [1] : vector<8x128xf32> to vector<8xf32>
    %16 = vector.shape_cast %15 : vector<8xf32> to vector<8x1xf32>
    %17 = vector.broadcast %12 : vector<1x128xf32> to vector<8x128xf32>
    %18 = arith.mulf %11, %17 : vector<8x128xf32>
    %cst_11 = arith.constant dense<0.000000e+00> : vector<8xf32>
    %19 = vector.multi_reduction <add>, %18, %cst_11 [1] : vector<8x128xf32> to vector<8xf32>
    %20 = vector.shape_cast %19 : vector<8xf32> to vector<8x1xf32>
    %21 = arith.subf %16, %20 : vector<8x1xf32>
    %22 = arith.negf %21 : vector<8x1xf32>
    %23 = math.exp %22 : vector<8x1xf32>
    %cst_12 = arith.constant 1.000000e+00 : f32
    %24 = vector.broadcast %cst_12 : f32 to vector<8x1xf32>
    %25 = arith.addf %24, %23 : vector<8x1xf32>
    %26 = arith.divf %24, %25 : vector<8x1xf32>
    %c0_13 = arith.constant 0 : index
    %c0_14 = arith.constant 0 : index
    %27 = vector.load %arg1[%c0_13, %c0_14] : memref<8x128xf32, #tpu.memory_space<vmem>>, vector<8x128xf32>
    %c0_15 = arith.constant 0 : index
    %c0_16 = arith.constant 0 : index
    %28 = vector.load %arg2[%c0_15, %c0_16] : memref<8x128xf32, #tpu.memory_space<vmem>>, vector<8x128xf32>
    %29 = arith.subf %27, %28 : vector<8x128xf32>
    %30 = vector.broadcast %26 : vector<8x1xf32> to vector<8x128xf32>
    %31 = arith.mulf %30, %29 : vector<8x128xf32>
    %32 = arith.addf %28, %31 : vector<8x128xf32>
    %c0_17 = arith.constant 0 : index
    %c0_18 = arith.constant 0 : index
    %33 = vector.load %arg6[%c0_17, %c0_18] : memref<8x128xf32, #tpu.memory_space<vmem>>, vector<8x128xf32>
    tpu.vector_store %arg6[%c0_17, %c0_18], %32 {strides = array<i32>} : memref<8x128xf32, #tpu.memory_space<vmem>>, vector<8x128xf32>,
    return
  }
  func.func @transform_0(%arg0: i32) -> (i32, i32) {
    %c0_i32 = arith.constant 0 : i32
    %c0_i32_0 = arith.constant 0 : i32
    return %arg0, %c0_i32 : i32, i32
  }
  func.func @transform_1(%arg0: i32) -> (i32, i32) {
    %c0_i32 = arith.constant 0 : i32
    %c0_i32_0 = arith.constant 0 : i32
    return %arg0, %c0_i32 : i32, i32
  }
  func.func @transform_2(%arg0: i32) -> (i32, i32) {
    %c0_i32 = arith.constant 0 : i32
    %c0_i32_0 = arith.constant 0 : i32
    %c0_i32_1 = arith.constant 0 : i32
    return %c0_i32, %c0_i32_0 : i32, i32
  }
  func.func @transform_3(%arg0: i32) -> (i32, i32) {
    %c0_i32 = arith.constant 0 : i32
    %c0_i32_0 = arith.constant 0 : i32
    %c0_i32_1 = arith.constant 0 : i32
    return %c0_i32, %c0_i32_0 : i32, i32
  }
  func.func @transform_4(%arg0: i32) -> (i32, i32) {
    %c0_i32 = arith.constant 0 : i32
    %c0_i32_0 = arith.constant 0 : i32
    %c0_i32_1 = arith.constant 0 : i32
    return %c0_i32, %c0_i32_0 : i32, i32
  }
  func.func @transform_5(%arg0: i32) -> (i32, i32) {
    %c0_i32 = arith.constant 0 : i32
    %c0_i32_0 = arith.constant 0 : i32
    return %arg0, %c0_i32 : i32, i32
  }
}

</mosaic_0001>

<bundles_post_ra>
// kernel: tpu_custom_call.1
= control target key start
LH: loop header
LB: loop body
LE: loop exit
PB: predicated region body
PF: predicated region fallthrough
CT: control target
= control target key end

     0   :  { %s1232_s0 = inlined_call_operand.hbm [shape: f32[16,128], index: 0, kind: input, shape index: {}]   ;;  %s1233_s1 = inlined_call_operand.hbm [shape: f32[16,128], index: 1, kind: input, shape index: {}]   ;;  %s1234_s2 = inlined_call_operand.hbm [shape: f32[128,128], index: 2, kind: input, shape index: {}]   ;;  %s1235_s3 = inlined_call_operand.vmem [shape: f32[1,128], index: 3, kind: input, shape index: {}]   ;;  %s1236_s4 = inlined_call_operand.vmem [shape: f32[1,128], index: 4, kind: input, shape index: {}]   ;;  %s1237_s5 = inlined_call_operand.hbm [shape: f32[16,128], index: 5, kind: output, shape index: {}]  }
   0x1   :  { %1242 = sst [smem:[#allocation14_spill]] %s1234_s2 }
   0x2   :  { %10 = vsyncpa [#allocation3], 0 }
   0x3   :  { %12 = vsyncpa [#allocation3 + $0x1], 0 }
   0x4   :  { %13 = vsyncpa [#allocation6], 0 }
   0x5   :  { %15 = vsyncpa [#allocation6 + $0x1], 0 }
   0x6   :  { %16 = vsyncpa [#allocation4], 0 }
   0x7   :  { %18 = vsyncpa [#allocation4 + $0x1], 0  ;;  %s990_s18 = smov 0   ;;  %s992_s19 = smov 0  }
   0x8   :  { %s994_s20 = smov 0   ;;  %s996_s21 = smov 0  }
   0x9 LB: > { %s1011_s22 = sadd.s32 4294967295, %s950_s21   ;;  %s598_s23 = sadd.s32 4294967294, %s950_s21   ;;  %s950_s21 = sphi %s996_s21, %s1263_s21   ;;  %s946_s20 = sphi %s994_s20, %s1262_s20   ;;  %s942_s19 = sphi %s992_s19, %s1261_s19   ;;  %s938_s18 = sphi %s990_s18, %s1260_s18  }
   0xa   : > { %p44_p0 = scmp.ne.s32.totalorder %s942_s19, %s938_s18  ;;  %p1238_p1 = scmp.eq.s32.totalorder %s1011_s22, 0 }
   0xb   : > { %p163_p3 = scmp.eq.s32.totalorder %s598_s23, 1  ;;  %p599_p5 = scmp.ge.s32.totalorder %s950_s21, 1 }
   0xc   : > { %p1020_p4 = por %p1238_p1, %p44_p0  ;;  %p170_p7 = scmp.lt.s32.totalorder %s950_s21, 3 }
   0xd   : > { %p1025_p6 = por %p163_p3, %p44_p0  ;;  %s952_s27 = smov [#allocation7]  }
   0xe   : > { %s1243_s24 = scalar_select %p1020_p4, 1, 0 }
   0xf   : > { %s1244_s25 = scalar_select %p1025_p6, 1, 0 }
  0x10   : > { %p1030_p8 = pnand %p599_p5, %p170_p7  ;;  %s182_s28 = sshll.u32 %s952_s27, 4  ;;  %s183_s28 = int_to_ptr.vmem [resolvable:$true] %s182_s28 }
  0x11   : > { %s1044_s30 = sadd.s32 1, %s950_s21   ;;  %s31_s6 = sadd.s32 1, %s946_s20 }
  0x12   : > { %s1245_s26 = scalar_select %p1030_p8, 1, 0 }
  0x13   : > { %p732_p9 = pneg %p1030_p8  ;;  %s28_s7 = ssub.s32 %s950_s21, %s1044_s30 }
  0x14   : > { %s807_s8 = scalar_lea.vmem %s183_s28, 2048  ;;  %p815_p5 = scmp.lt.s32.totalorder %s183_s28, %s183_s28 }
  0x15   : > { %p1039_p11 = pnand %p732_p9, %p1238_p1  ;;  %p808_p13 = scmp.ne.s32.totalorder %s183_s28, %s807_s8 }
  0x16   : > { %p816_p7 = scmp.lt.s32.totalorder %s807_s8, %s807_s8 }
  0x17   : > { %p798_p12 = pneg %p1039_p11 }
  0x18   : > { %p817_p10 = por %p816_p7, %p815_p5 }
  0x19   : > { %p810_p0 = pnand %p808_p13, %p798_p12 }
  0x1b   : > { %p811_p3 = pneg %p810_p0 }
  0x1d   : > { %p818_p2 = pnand %p817_p10, %p811_p3 }
  0x1f   : > { %821 = shalt.err (!%p818_p2)
}
  0x20   : > { %s953_s9 = smov 128   ;;  %s954_s10 = smov 8  }
  0x21   : > { %s1247_s2 = sld [smem:[#allocation14_spill]]  ;;  %p29_p9 = scmp.eq.s32.totalorder %s28_s7, 0 }
  0x22   : > { %p38_p12 = scmp.ne.s32.totalorder %s946_s20, %s942_s19  ;;  %p39_p10 = scmp.eq.s32.totalorder %s950_s21, 0 }
  0x23   : > { %p748_p2 = scmp.lt.s32.totalorder %s950_s21, 2  ;;  %p1249_p0 = scmp.eq.s32.totalorder %s1011_s22, 1 }
  0x24   : > { %s1061_s13 = scalar_select %p29_p9, %s946_s20, %s31_s6  }
  0x25   : > { %p40_p13 = por %p39_p10, %p38_p12  ;;  %p1065_p3 = por %p1249_p0, %p38_p12 }
  0x26   : > { %1248 = sst [smem:[#allocation13_spill]] %s1061_s13  ;;  %s202_s15 = sand.u32 1, %s946_s20  }
  0x27   : > { %735 = dma.hbm_to_vmem [thread:$0]  (!%p1039_p11), %s1247_s2, 2048, %s183_s28, [#allocation6], %s953_s9, %s953_s9, %s954_s10  }
  0x28   : > { %s1250_s14 = scalar_select %p1065_p3, 1, 0 }
  0x29   : > { %s603_s16 = sshll.u32 %s950_s21, 7  ;;  %s1071_s17 = sshll.u32 %s202_s15, 3 }
  0x2a   : > { %s1076_s28 = scalar_lea.hbm %s1232_s0, %s603_s16  ;;  %s206_s29 = scalar_lea.vmem [#allocation2], %s1071_s17 }
  0x2b   : > { %s213_s6 = sshll.u32 %s206_s29, 4  ;;  %p1079_p11 = pnand %p748_p2, %p40_p13  ;;  %s214_s6 = int_to_ptr.vmem [resolvable:$true] %s213_s6 }
  0x2c   : > { %s1086_s10 = scalar_lea.hbm %s1233_s1, %s603_s16  ;;  %s203_s11 = scalar_lea.sflag [#allocation3], %s202_s15 }
  0x2d   : > { %s822_s12 = scalar_lea.hbm %s1076_s28, 128  ;;  %p824_p7 = pneg %p1079_p11 }
  0x2e   : > { %p823_p5 = scmp.ne.s32.totalorder %s1076_s28, %s822_s12  ;;  %s827_s29 = scalar_lea.hbm %s1232_s0, 256 }
  0x2f   : > { %p828_p10 = scmp.lt.s32.totalorder %s1076_s28, %s1232_s0  ;;  %p829_p2 = scmp.lt.s32.totalorder %s827_s29, %s822_s12 }
  0x30   : > { %p825_p9 = pnand %p824_p7, %p823_p5 }
  0x31   : > { %p830_p13 = por %p829_p2, %p828_p10 }
  0x32   : > { %p826_p12 = pneg %p825_p9 }
  0x34   : > { %p831_p0 = pnand %p830_p13, %p826_p12 }
  0x36   : > { %834 = shalt.err (!%p831_p0)
}
  0x37   : > { %s835_s15 = scalar_lea.vmem %s214_s6, 128  ;;  %s955_s16 = smov [#allocation2]  }
  0x38   : > { %p836_p1 = scmp.ne.s32.totalorder %s214_s6, %s835_s15  ;;  %s840_s8 = sshll.u32 %s955_s16, 4  ;;  %s841_s8 = int_to_ptr.vmem [resolvable:$false] %s840_s8 }
  0x39   : > { %s842_s9 = scalar_lea.vmem %s841_s8, 256  ;;  %p843_p9 = scmp.lt.s32.totalorder %s214_s6, %s841_s8 }
  0x3a   : > { %p838_p6 = pnand %p836_p1, %p824_p7  ;;  %p844_p3 = scmp.lt.s32.totalorder %s842_s9, %s835_s15 }
  0x3c   : > { %p839_p5 = pneg %p838_p6  ;;  %p845_p4 = por %p844_p3, %p843_p9 }
  0x3e   : > { %p846_p8 = pnand %p845_p4, %p839_p5 }
  0x40   : > { %849 = shalt.err (!%p846_p8)
}
  0x41   : > { %739 = dma.hbm_to_vmem [thread:$0]  (!%p1079_p11), %s1076_s28, 128, %s214_s6, %s203_s11  }
  0x42   : > { %s220_s2 = sand.u32 1, %s950_s21   ;;  %s224_s13 = scalar_lea.vmem [#allocation5], %s1071_s17 }
  0x43   : > { %s231_s12 = sshll.u32 %s224_s13, 4  ;;  %s221_s23 = scalar_lea.sflag [#allocation6], %s220_s2  ;;  %s232_s12 = int_to_ptr.vmem [resolvable:$true] %s231_s12 }
  0x44   : > { %s850_s27 = scalar_lea.hbm %s1086_s10, 128  ;;  %s855_s16 = scalar_lea.hbm %s1233_s1, 256 }
  0x45   : > { %p851_p1 = scmp.ne.s32.totalorder %s1086_s10, %s850_s27  ;;  %p856_p8 = scmp.lt.s32.totalorder %s1086_s10, %s1233_s1 }
  0x46   : > { %p857_p3 = scmp.lt.s32.totalorder %s855_s16, %s850_s27 }
  0x47   : > { %p853_p4 = pnand %p851_p1, %p824_p7 }
  0x48   : > { %p858_p12 = por %p857_p3, %p856_p8 }
  0x49   : > { %p854_p6 = pneg %p853_p4 }
  0x4b   : > { %p859_p10 = pnand %p858_p12, %p854_p6 }
  0x4d   : > { %862 = shalt.err (!%p859_p10)
}
  0x4e   : > { %s863_s17 = scalar_lea.vmem %s232_s12, 128  ;;  %s956_s28 = smov [#allocation5]  }
  0x4f   : > { %p864_p2 = scmp.ne.s32.totalorder %s232_s12, %s863_s17  ;;  %s868_s6 = sshll.u32 %s956_s28, 4  ;;  %s869_s6 = int_to_ptr.vmem [resolvable:$false] %s868_s6 }
  0x50   : > { %s870_s11 = scalar_lea.vmem %s869_s6, 256  ;;  %p871_p5 = scmp.lt.s32.totalorder %s232_s12, %s869_s6 }
  0x51   : > { %p866_p13 = pnand %p864_p2, %p824_p7  ;;  %p872_p9 = scmp.lt.s32.totalorder %s870_s11, %s863_s17 }
  0x53   : > { %p867_p0 = pneg %p866_p13  ;;  %p873_p1 = por %p872_p9, %p871_p5 }
  0x55   : > { %p874_p4 = pnand %p873_p1, %p867_p0 }
  0x57   : > { %877 = shalt.err (!%p874_p4)
}
  0x58   : > { %742 = dma.hbm_to_vmem [thread:$0]  (!%p1079_p11), %s1086_s10, 128, %s232_s12, %s221_s23  }
  0x59   : > { %p1252_p6 = scmp.ne.s32.totalorder %s1245_s26, 0 }
  0x5a   : > { %s1131_s2 = sand.u32 (!%p1252_p6), 1, %s942_s19   ;;  %p1253_p7 = scmp.ne.s32.totalorder (!%p1252_p6), %s1243_s24, 0 }
  0x5b   : > { %240 = sbr.rel (%p1252_p6) target bundleno = 541 (0x21d), region = 40  ;;  %s1134_s13 = sshll.u32 (!%p1252_p6), %s1131_s2, 3 }
  0x5c   : > { %s243_s27 = scalar_lea.sflag (!%p1252_p6), [#allocation3], %s1131_s2  ;;  %s246_s29 = scalar_lea.vmem (!%p1252_p6), [#allocation2], %s1134_s13 }
  0x60   : > { %921 = dma.done.wait (%p1253_p7), %s243_s27, 128  }
  0x61   : > { %923 = vsyncadd (%p1253_p7), %s243_s27, 4294967168  ;;  %s251_s26 = sand.u32 1, %s1011_s22   ;;  %s255_s10 = scalar_lea.vmem [#allocation5], %s1134_s13 }
  0x62   : > { %s252_s7 = scalar_lea.sflag [#allocation6], %s251_s26 }
  0x63   : > { %925 = dma.done.wait (%p1253_p7), %s252_s7, 128  }
  0x64   : > { %927 = vsyncadd (%p1253_p7), %s252_s7, 4294967168  ;;  %p1254_p11 = scmp.eq.s32.totalorder %s1011_s22, 0 }
  0x66   : > { %929 = dma.done.wait (%p1254_p11), [#allocation6], 2048   ;;  %p1255_p8 = pmov %p1254_p11 }
  0x67   : > { %v957_v0 = vmov 0.0   ;;  %vm958_vm0 = vmmov 0   ;;  %v306_v1 = vld [vmem:[#allocation7 + $0x78] sm:$0xff]  ;;  %v305_v2 = vld [vmem:[#allocation7 + $0x70] sm:$0xff]  ;;  %v304_v3 = vld [vmem:[#allocation7 + $0x68] sm:$0xff]  ;;  %s615_s16 = sshll.u32 %s1011_s22, 7 }
  0x68   : > { %931 = vsyncadd (%p1255_p8), [#allocation6], 4294965248  ;;  %652 = vmatprep.subr.mxu0 %v957_v0  ;;  %687 = vmatprep.subr.mxu1 %v957_v0  ;;  %v303_v4 = vld [vmem:[#allocation7 + $0x60] sm:$0xff]  ;;  %v302_v5 = vld [vmem:[#allocation7 + $0x58] sm:$0xff]  ;;  %s290_s8 = scalar_lea.vmem [#allocation8], %s1134_s13  ;;  %s494_s6 = scalar_lea.hbm %s1237_s5, %s615_s16 }
  0x69   : > { %684 = vmatprep.mubr.msk.f32.mxu0 %vm958_vm0, %v957_v0  ;;  %719 = vmatprep.mubr.msk.f32.mxu1 %vm958_vm0, %v957_v0  ;;  %v301_v6 = vld [vmem:[#allocation7 + $0x50] sm:$0xff]  ;;  %v300_v7 = vld [vmem:[#allocation7 + $0x48] sm:$0xff]  ;;  %v299_v8 = vld [vmem:[#allocation7 + $0x40] sm:$0xff]  ;;  %s496_s9 = sshll.u32 %s290_s8, 4  ;;  %s483_s11 = scalar_lea.sflag [#allocation4], %s1131_s2  ;;  %s497_s9 = int_to_ptr.vmem [resolvable:$true] %s496_s9 }
  0x6a   : > { %653 = vmatpush3.msra.mxu0 %v306_v1  ;;  %688 = vmatpush3.msra.mxu1 %v306_v1  ;;  %v298_v9 = vld [vmem:[#allocation7 + $0x38] sm:$0xff]  ;;  %v297_v10 = vld [vmem:[#allocation7 + $0x30] sm:$0xff]  ;;  %v296_v11 = vld [vmem:[#allocation7 + $0x28] sm:$0xff]  ;;  %s878_s27 = scalar_lea.vmem %s497_s9, 128  ;;  %p1256_p12 = scmp.ne.s32.totalorder %s1250_s14, 0 }
  0x6b   : > { %654 = vmatprep.subr.mxu0 %v957_v0  ;;  %689 = vmatprep.subr.mxu1 %v957_v0  ;;  %v295_v12 = vld [vmem:[#allocation7 + $0x20] sm:$0xff]  ;;  %v294_v13 = vld [vmem:[#allocation7 + $0x18] sm:$0xff]  ;;  %v293_v14 = vld [vmem:[#allocation7 + $0x10] sm:$0xff]  ;;  %p879_p3 = scmp.ne.s32.totalorder %s497_s9, %s878_s27 }
  0x6c   : > { %655 = vmatpush3.msra.mxu0 %v305_v2  ;;  %690 = vmatpush3.msra.mxu1 %v305_v2  ;;  %v292_v15 = vld [vmem:[#allocation7 + $0x8] sm:$0xff]  ;;  %v291_v16 = vld [vmem:[#allocation7] sm:$0xff]  ;;  %v308_v18 = vld [vmem:[%s255_s10] sm:$0xff] }
  0x6d   : > { %656 = vmatprep.subr.mxu0 %v957_v0  ;;  %691 = vmatprep.subr.mxu1 %v957_v0  ;;  %v307_v17 = vld [vmem:[%s246_s29] sm:$0xff]  ;;  %p880_p10 = pnand %p879_p3, %p1256_p12  ;;  %s959_s29 = smov [#allocation8]  }
  0x6e   : > { %657 = vmatpush3.msra.mxu0 %v304_v3  ;;  %692 = vmatpush3.msra.mxu1 %v304_v3  ;;  %v611_v19 = vld [vmem:[%s1235_s3] ss:$0 sm:$0xff]  ;;  %v478_v37 = vsub.f32 %v307_v17, %v308_v18  ;;  %s882_s26 = sshll.u32 %s959_s29, 4  ;;  %s883_s26 = int_to_ptr.vmem [resolvable:$false] %s882_s26 }
  0x6f   : > { %658 = vmatprep.subr.mxu0 %v957_v0  ;;  %693 = vmatprep.subr.mxu1 %v957_v0  ;;  %v612_v26 = vld [vmem:[%s1236_s4] ss:$0 sm:$0xff]  ;;  %p881_p2 = pneg %p880_p10  ;;  %s884_s22 = scalar_lea.vmem %s883_s26, 256 }
  0x70   : > { %659 = vmatpush3.msra.mxu0 %v303_v4  ;;  %694 = vmatpush3.msra.mxu1 %v303_v4  ;;  %p885_p13 = scmp.lt.s32.totalorder %s497_s9, %s883_s26  ;;  %p886_p0 = scmp.lt.s32.totalorder %s884_s22, %s878_s27 }
  0x71   : > { %660 = vmatprep.subr.mxu0 %v957_v0  ;;  %695 = vmatprep.subr.mxu1 %v957_v0 }
  0x72   : > { %661 = vmatpush3.msra.mxu0 %v302_v5  ;;  %696 = vmatpush3.msra.mxu1 %v302_v5  ;;  %p887_p5 = por %p886_p0, %p885_p13 }
  0x73   : > { %662 = vmatprep.subr.mxu0 %v957_v0  ;;  %697 = vmatprep.subr.mxu1 %v957_v0 }
  0x74   : > { %663 = vmatpush3.msra.mxu0 %v301_v6  ;;  %698 = vmatpush3.msra.mxu1 %v301_v6  ;;  %p888_p9 = pnand %p887_p5, %p881_p2 }
  0x75   : > { %664 = vmatprep.subr.mxu0 %v957_v0  ;;  %699 = vmatprep.subr.mxu1 %v957_v0 }
  0x76   : > { %665 = vmatpush3.msra.mxu0 %v300_v7  ;;  %700 = vmatpush3.msra.mxu1 %v300_v7 }
  0x77   : > { %666 = vmatprep.subr.mxu0 %v957_v0  ;;  %701 = vmatprep.subr.mxu1 %v957_v0 }
  0x78   : > { %667 = vmatpush3.msra.mxu0 %v299_v8  ;;  %702 = vmatpush3.msra.mxu1 %v299_v8 }
  0x79   : > { %668 = vmatprep.subr.mxu0 %v957_v0  ;;  %703 = vmatprep.subr.mxu1 %v957_v0 }
  0x7a   : > { %669 = vmatpush3.msra.mxu0 %v298_v9  ;;  %704 = vmatpush3.msra.mxu1 %v298_v9 }
  0x7b   : > { %670 = vmatprep.subr.mxu0 %v957_v0  ;;  %705 = vmatprep.subr.mxu1 %v957_v0 }
  0x7c   : > { %671 = vmatpush3.msra.mxu0 %v297_v10  ;;  %706 = vmatpush3.msra.mxu1 %v297_v10 }
  0x7d   : > { %672 = vmatprep.subr.mxu0 %v957_v0  ;;  %707 = vmatprep.subr.mxu1 %v957_v0 }
  0x7e   : > { %673 = vmatpush3.msra.mxu0 %v296_v11  ;;  %708 = vmatpush3.msra.mxu1 %v296_v11 }
  0x7f   : > { %674 = vmatprep.subr.mxu0 %v957_v0  ;;  %709 = vmatprep.subr.mxu1 %v957_v0 }
  0x80   : > { %675 = vmatpush3.msra.mxu0 %v295_v12  ;;  %710 = vmatpush3.msra.mxu1 %v295_v12 }
  0x81   : > { %676 = vmatprep.subr.mxu0 %v957_v0  ;;  %711 = vmatprep.subr.mxu1 %v957_v0 }
  0x82   : > { %677 = vmatpush3.msra.mxu0 %v294_v13  ;;  %712 = vmatpush3.msra.mxu1 %v294_v13 }
  0x83   : > { %678 = vmatprep.subr.mxu0 %v957_v0  ;;  %713 = vmatprep.subr.mxu1 %v957_v0 }
  0x84   : > { %679 = vmatpush3.msra.mxu0 %v293_v14  ;;  %714 = vmatpush3.msra.mxu1 %v293_v14 }
  0x85   : > { %680 = vmatprep.subr.mxu0 %v957_v0  ;;  %715 = vmatprep.subr.mxu1 %v957_v0 }
  0x86   : > { %681 = vmatpush3.msra.mxu0 %v292_v15  ;;  %716 = vmatpush3.msra.mxu1 %v292_v15 }
  0x87   : > { %682 = vmatprep.subr.mxu0 %v957_v0  ;;  %717 = vmatprep.subr.mxu1 %v957_v0 }
  0x88   : > { %683 = vmatpush3.msra.mxu0 %v291_v16  ;;  %718 = vmatpush3.msra.mxu1 %v291_v16 }
  0x89   : > { %685 = vmatmul.mubr.f32.vlgmr.msra.gmra.mxu0 %v307_v17  ;;  %720 = vmatmul.mubr.f32.vlgmr.msra.gmra.mxu1 %v308_v18 }
 0x149   : > { %v382_v20 = vpop.f32.mrf.mxu0  ;;  %v453_v21 = vpop.f32.mrf.mxu1 }
 0x14a   : > { %v383_v22 = vadd.f32 %v611_v19, %v382_v20  ;;  %v454_v23 = vadd.f32 %v611_v19, %v453_v21 }
 0x14b   : > { %v686_v24 = vpop.f32.mrf.mxu0  ;;  %v721_v25 = vpop.f32.mrf.mxu1 }
 0x14c   : > { %788 = vtanh.f32 %v383_v22 }
 0x14d   : > { %790 = vtanh.f32 %v454_v23 }
 0x159   : > { %v789_v27 = vpop.eup %788 }
 0x15a   : > { %v791_v28 = vpop.eup %790  ;;  %v465_v29 = vmul.f32 %v789_v27, %v612_v26 }
 0x15b   : > { %v468_v30 = vmul.f32 %v791_v28, %v612_v26 }
 0x15c   : > { %466 = vadd.xlane.f32.xlu0 %v465_v29 }
 0x160   : > { %469 = vadd.xlane.f32.xlu0 %v468_v30 }
 0x1e5   : > { %v467_v31 = vpop.xlane.xlu0 %466 }
 0x1e9   : > { %v470_v32 = vpop.xlane.xlu0 %469 }
 0x1ea   : > { %v471_v33 = vsub.f32 %v467_v31, %v470_v32 }
 0x1ec   : > { %v613_v34 = vmul.f32 -1.442695, %v471_v33 }
 0x1ee   : > { %792 = vpow2.f32 %v613_v34 }
 0x1fb   : > { %v793_v35 = vpop.eup %792 }
 0x1fc   : > { %v475_v36 = vadd.f32 1.0, %v793_v35 }
 0x1fe   : > { %794 = vrcp.f32 %v475_v36 }
 0x20b   : > { %v795_v38 = vpop.eup %794 }
 0x20c   : > { %v479_v39 = vmul.f32 %v795_v38, %v478_v37 }
 0x20e   : > { %v480_v40 = vadd.f32 %v479_v39, %v308_v18 }
 0x210   : > { %481 = vst [vmem:[%s290_s8] sm:$0xff] %v480_v40 }
 0x211   : > { %891 = shalt.err (!%p888_p9)
}
 0x212   : > { %s892_s13 = scalar_lea.hbm %s494_s6, 128  ;;  %s896_s10 = scalar_lea.hbm %s1237_s5, 256 }
 0x213   : > { %p893_p1 = scmp.ne.s32.totalorder %s494_s6, %s892_s13  ;;  %p897_p7 = scmp.lt.s32.totalorder %s494_s6, %s1237_s5 }
 0x214   : > { %p898_p11 = scmp.lt.s32.totalorder %s896_s10, %s892_s13 }
 0x215   : > { %p894_p4 = pnand %p893_p1, %p1256_p12 }
 0x216   : > { %p899_p8 = por %p898_p11, %p897_p7 }
 0x217   : > { %p895_p6 = pneg %p894_p4 }
 0x219   : > { %p900_p3 = pnand %p899_p8, %p895_p6 }
 0x21b   : > { %903 = shalt.err (!%p900_p3)
}
 0x21c   : > { %730 = dma.vmem_to_hbm [thread:$0]  (%p1256_p12), %s497_s9, 128, %s494_s6, %s483_s11  }
 0x21d PF: > { %s508_s23 = sand.u32 1, %s938_s18   ;;  %p1257_p10 = scmp.ne.s32.totalorder %s1244_s25, 0 }
 0x21e   : > { %p1258_p2 = scmp.ge.s32.totalorder %s950_s21, 2  ;;  %s509_s15 = scalar_lea.sflag [#allocation4], %s508_s23 }
 0x220   : > { %p744_p13 = pnand %p1258_p2, %p1257_p10 }
 0x222   : > { %p745_p0 = pneg %p744_p13 }
 0x224   : > { %933 = dma.done.wait (%p745_p0), %s509_s15, 128  }
 0x225   : > { %935 = vsyncadd (%p745_p0), %s509_s15, 4294967168  ;;  %s1259_s16 = sld [smem:[#allocation13_spill]]  ;;  %p21_p5 = scmp.ge.s32.totalorder %s1044_s30, 4  }
 0x226   : > { %s1260_s18 = smov %s942_s19  ;;  %s1261_s19 = smov %s946_s20 }
 0x227   : > { %s1263_s21 = smov %s1044_s30  ;;  %23 = sbr.rel (!%p21_p5) target bundleno = 9 (0x9), region = 102 }
 0x22b   : > { %s1262_s20 = smov %s1259_s16 }
 0x22c   :  { %514 = vsyncpa [#allocation3], 1 }
 0x22d   :  { %516 = vsyncpa [#allocation3 + $0x1], 1 }
 0x22e   :  { %517 = vsyncpa [#allocation6], 1 }
 0x22f   :  { %519 = vsyncpa [#allocation6 + $0x1], 1 }
 0x230   :  { %520 = vsyncpa [#allocation4], 1 }
 0x231   :  { %522 = vsyncpa [#allocation4 + $0x1], 1 }

// kernel: tpu_custom_call.1
= control target key start
LH: loop header
LB: loop body
LE: loop exit
PB: predicated region body
PF: predicated region fallthrough
CT: control target
= control target key end

     0   :  { %s1232_s0 = inlined_call_operand.hbm [shape: f32[16,128], index: 0, kind: input, shape index: {}]   ;;  %s1233_s1 = inlined_call_operand.hbm [shape: f32[16,128], index: 1, kind: input, shape index: {}]   ;;  %s1234_s2 = inlined_call_operand.hbm [shape: f32[128,128], index: 2, kind: input, shape index: {}]   ;;  %s1235_s3 = inlined_call_operand.vmem [shape: f32[1,128], index: 3, kind: input, shape index: {}]   ;;  %s1236_s4 = inlined_call_operand.vmem [shape: f32[1,128], index: 4, kind: input, shape index: {}]   ;;  %s1237_s5 = inlined_call_operand.hbm [shape: f32[16,128], index: 5, kind: output, shape index: {}]  }
   0x1   :  { %1242 = sst [smem:[#allocation14_spill]] %s1234_s2 }
   0x2   :  { %10 = vsyncpa [#allocation3], 0 }
   0x3   :  { %12 = vsyncpa [#allocation3 + $0x1], 0 }
   0x4   :  { %13 = vsyncpa [#allocation6], 0 }
   0x5   :  { %15 = vsyncpa [#allocation6 + $0x1], 0 }
   0x6   :  { %16 = vsyncpa [#allocation4], 0 }
   0x7   :  { %18 = vsyncpa [#allocation4 + $0x1], 0  ;;  %s990_s18 = smov 0   ;;  %s992_s19 = smov 0  }
   0x8   :  { %s994_s20 = smov 0   ;;  %s996_s21 = smov 0  }
   0x9 LB: > { %s1011_s22 = sadd.s32 4294967295, %s950_s21   ;;  %s598_s23 = sadd.s32 4294967294, %s950_s21   ;;  %s950_s21 = sphi %s996_s21, %s1263_s21   ;;  %s946_s20 = sphi %s994_s20, %s1262_s20   ;;  %s942_s19 = sphi %s992_s19, %s1261_s19   ;;  %s938_s18 = sphi %s990_s18, %s1260_s18  }
   0xa   : > { %p44_p0 = scmp.ne.s32.totalorder %s942_s19, %s938_s18  ;;  %p1238_p1 = scmp.eq.s32.totalorder %s1011_s22, 0 }
   0xb   : > { %p163_p3 = scmp.eq.s32.totalorder %s598_s23, 1  ;;  %p599_p5 = scmp.ge.s32.totalorder %s950_s21, 1 }
   0xc   : > { %p1020_p4 = por %p1238_p1, %p44_p0  ;;  %p170_p7 = scmp.lt.s32.totalorder %s950_s21, 3 }
   0xd   : > { %p1025_p6 = por %p163_p3, %p44_p0  ;;  %s952_s27 = smov [#allocation7]  }
   0xe   : > { %s1243_s24 = scalar_select %p1020_p4, 1, 0 }
   0xf   : > { %s1244_s25 = scalar_select %p1025_p6, 1, 0 }
  0x10   : > { %p1030_p8 = pnand %p599_p5, %p170_p7  ;;  %s182_s28 = sshll.u32 %s952_s27, 4  ;;  %s183_s28 = int_to_ptr.vmem [resolvable:$true] %s182_s28 }
  0x11   : > { %s1044_s30 = sadd.s32 1, %s950_s21   ;;  %s31_s6 = sadd.s32 1, %s946_s20 }
  0x12   : > { %s1245_s26 = scalar_select %p1030_p8, 1, 0 }
  0x13   : > { %p732_p9 = pneg %p1030_p8  ;;  %s28_s7 = ssub.s32 %s950_s21, %s1044_s30 }
  0x14   : > { %s807_s8 = scalar_lea.vmem %s183_s28, 2048  ;;  %p815_p5 = scmp.lt.s32.totalorder %s183_s28, %s183_s28 }
  0x15   : > { %p1039_p11 = pnand %p732_p9, %p1238_p1  ;;  %p808_p13 = scmp.ne.s32.totalorder %s183_s28, %s807_s8 }
  0x16   : > { %p816_p7 = scmp.lt.s32.totalorder %s807_s8, %s807_s8 }
  0x17   : > { %p798_p12 = pneg %p1039_p11 }
  0x18   : > { %p817_p10 = por %p816_p7, %p815_p5 }
  0x19   : > { %p810_p0 = pnand %p808_p13, %p798_p12 }
  0x1b   : > { %p811_p3 = pneg %p810_p0 }
  0x1d   : > { %p818_p2 = pnand %p817_p10, %p811_p3 }
  0x1f   : > { %821 = shalt.err (!%p818_p2)
}
  0x20   : > { %s953_s9 = smov 128   ;;  %s954_s10 = smov 8  }
  0x21   : > { %s1247_s2 = sld [smem:[#allocation14_spill]]  ;;  %p29_p9 = scmp.eq.s32.totalorder %s28_s7, 0 }
  0x22   : > { %p38_p12 = scmp.ne.s32.totalorder %s946_s20, %s942_s19  ;;  %p39_p10 = scmp.eq.s32.totalorder %s950_s21, 0 }
  0x23   : > { %p748_p2 = scmp.lt.s32.totalorder %s950_s21, 2  ;;  %p1249_p0 = scmp.eq.s32.totalorder %s1011_s22, 1 }
  0x24   : > { %s1061_s13 = scalar_select %p29_p9, %s946_s20, %s31_s6  }
  0x25   : > { %p40_p13 = por %p39_p10, %p38_p12  ;;  %p1065_p3 = por %p1249_p0, %p38_p12 }
  0x26   : > { %1248 = sst [smem:[#allocation13_spill]] %s1061_s13  ;;  %s202_s15 = sand.u32 1, %s946_s20  }
  0x27   : > { %735 = dma.hbm_to_vmem [thread:$0]  (!%p1039_p11), %s1247_s2, 2048, %s183_s28, [#allocation6], %s953_s9, %s953_s9, %s954_s10  }
  0x28   : > { %s1250_s14 = scalar_select %p1065_p3, 1, 0 }
  0x29   : > { %s603_s16 = sshll.u32 %s950_s21, 7  ;;  %s1071_s17 = sshll.u32 %s202_s15, 3 }
  0x2a   : > { %s1076_s28 = scalar_lea.hbm %s1232_s0, %s603_s16  ;;  %s206_s29 = scalar_lea.vmem [#allocation2], %s1071_s17 }
  0x2b   : > { %s213_s6 = sshll.u32 %s206_s29, 4  ;;  %p1079_p11 = pnand %p748_p2, %p40_p13  ;;  %s214_s6 = int_to_ptr.vmem [resolvable:$true] %s213_s6 }
  0x2c   : > { %s1086_s10 = scalar_lea.hbm %s1233_s1, %s603_s16  ;;  %s203_s11 = scalar_lea.sflag [#allocation3], %s202_s15 }
  0x2d   : > { %s822_s12 = scalar_lea.hbm %s1076_s28, 128  ;;  %p824_p7 = pneg %p1079_p11 }
  0x2e   : > { %p823_p5 = scmp.ne.s32.totalorder %s1076_s28, %s822_s12  ;;  %s827_s29 = scalar_lea.hbm %s1232_s0, 256 }
  0x2f   : > { %p828_p10 = scmp.lt.s32.totalorder %s1076_s28, %s1232_s0  ;;  %p829_p2 = scmp.lt.s32.totalorder %s827_s29, %s822_s12 }
  0x30   : > { %p825_p9 = pnand %p824_p7, %p823_p5 }
  0x31   : > { %p830_p13 = por %p829_p2, %p828_p10 }
  0x32   : > { %p826_p12 = pneg %p825_p9 }
  0x34   : > { %p831_p0 = pnand %p830_p13, %p826_p12 }
  0x36   : > { %834 = shalt.err (!%p831_p0)
}
  0x37   : > { %s835_s15 = scalar_lea.vmem %s214_s6, 128  ;;  %s955_s16 = smov [#allocation2]  }
  0x38   : > { %p836_p1 = scmp.ne.s32.totalorder %s214_s6, %s835_s15  ;;  %s840_s8 = sshll.u32 %s955_s16, 4  ;;  %s841_s8 = int_to_ptr.vmem [resolvable:$false] %s840_s8 }
  0x39   : > { %s842_s9 = scalar_lea.vmem %s841_s8, 256  ;;  %p843_p9 = scmp.lt.s32.totalorder %s214_s6, %s841_s8 }
  0x3a   : > { %p838_p6 = pnand %p836_p1, %p824_p7  ;;  %p844_p3 = scmp.lt.s32.totalorder %s842_s9, %s835_s15 }
  0x3c   : > { %p839_p5 = pneg %p838_p6  ;;  %p845_p4 = por %p844_p3, %p843_p9 }
  0x3e   : > { %p846_p8 = pnand %p845_p4, %p839_p5 }
  0x40   : > { %849 = shalt.err (!%p846_p8)
}
  0x41   : > { %739 = dma.hbm_to_vmem [thread:$0]  (!%p1079_p11), %s1076_s28, 128, %s214_s6, %s203_s11  }
  0x42   : > { %s220_s2 = sand.u32 1, %s950_s21   ;;  %s224_s13 = scalar_lea.vmem [#allocation5], %s1071_s17 }
  0x43   : > { %s231_s12 = sshll.u32 %s224_s13, 4  ;;  %s221_s23 = scalar_lea.sflag [#allocation6], %s220_s2  ;;  %s232_s12 = int_to_ptr.vmem [resolvable:$true] %s231_s12 }
  0x44   : > { %s850_s27 = scalar_lea.hbm %s1086_s10, 128  ;;  %s855_s16 = scalar_lea.hbm %s1233_s1, 256 }
  0x45   : > { %p851_p1 = scmp.ne.s32.totalorder %s1086_s10, %s850_s27  ;;  %p856_p8 = scmp.lt.s32.totalorder %s1086_s10, %s1233_s1 }
  0x46   : > { %p857_p3 = scmp.lt.s32.totalorder %s855_s16, %s850_s27 }
  0x47   : > { %p853_p4 = pnand %p851_p1, %p824_p7 }
  0x48   : > { %p858_p12 = por %p857_p3, %p856_p8 }
  0x49   : > { %p854_p6 = pneg %p853_p4 }
  0x4b   : > { %p859_p10 = pnand %p858_p12, %p854_p6 }
  0x4d   : > { %862 = shalt.err (!%p859_p10)
}
  0x4e   : > { %s863_s17 = scalar_lea.vmem %s232_s12, 128  ;;  %s956_s28 = smov [#allocation5]  }
  0x4f   : > { %p864_p2 = scmp.ne.s32.totalorder %s232_s12, %s863_s17  ;;  %s868_s6 = sshll.u32 %s956_s28, 4  ;;  %s869_s6 = int_to_ptr.vmem [resolvable:$false] %s868_s6 }
  0x50   : > { %s870_s11 = scalar_lea.vmem %s869_s6, 256  ;;  %p871_p5 = scmp.lt.s32.totalorder %s232_s12, %s869_s6 }
  0x51   : > { %p866_p13 = pnand %p864_p2, %p824_p7  ;;  %p872_p9 = scmp.lt.s32.totalorder %s870_s11, %s863_s17 }
  0x53   : > { %p867_p0 = pneg %p866_p13  ;;  %p873_p1 = por %p872_p9, %p871_p5 }
  0x55   : > { %p874_p4 = pnand %p873_p1, %p867_p0 }
  0x57   : > { %877 = shalt.err (!%p874_p4)
}
  0x58   : > { %742 = dma.hbm_to_vmem [thread:$0]  (!%p1079_p11), %s1086_s10, 128, %s232_s12, %s221_s23  }
  0x59   : > { %p1252_p6 = scmp.ne.s32.totalorder %s1245_s26, 0 }
  0x5a   : > { %s1131_s2 = sand.u32 (!%p1252_p6), 1, %s942_s19   ;;  %p1253_p7 = scmp.ne.s32.totalorder (!%p1252_p6), %s1243_s24, 0 }
  0x5b   : > { %240 = sbr.rel (%p1252_p6) target bundleno = 541 (0x21d), region = 40  ;;  %s1134_s13 = sshll.u32 (!%p1252_p6), %s1131_s2, 3 }
  0x5c   : > { %s243_s27 = scalar_lea.sflag (!%p1252_p6), [#allocation3], %s1131_s2  ;;  %s246_s29 = scalar_lea.vmem (!%p1252_p6), [#allocation2], %s1134_s13 }
  0x60   : > { %921 = dma.done.wait (%p1253_p7), %s243_s27, 128  }
  0x61   : > { %923 = vsyncadd (%p1253_p7), %s243_s27, 4294967168  ;;  %s251_s26 = sand.u32 1, %s1011_s22   ;;  %s255_s10 = scalar_lea.vmem [#allocation5], %s1134_s13 }
  0x62   : > { %s252_s7 = scalar_lea.sflag [#allocation6], %s251_s26 }
  0x63   : > { %925 = dma.done.wait (%p1253_p7), %s252_s7, 128  }
  0x64   : > { %927 = vsyncadd (%p1253_p7), %s252_s7, 4294967168  ;;  %p1254_p11 = scmp.eq.s32.totalorder %s1011_s22, 0 }
  0x66   : > { %929 = dma.done.wait (%p1254_p11), [#allocation6], 2048   ;;  %p1255_p8 = pmov %p1254_p11 }
  0x67   : > { %v957_v0 = vmov 0.0   ;;  %vm958_vm0 = vmmov 0   ;;  %v306_v1 = vld [vmem:[#allocation7 + $0x78] sm:$0xff]  ;;  %v305_v2 = vld [vmem:[#allocation7 + $0x70] sm:$0xff]  ;;  %v304_v3 = vld [vmem:[#allocation7 + $0x68] sm:$0xff]  ;;  %s615_s16 = sshll.u32 %s1011_s22, 7 }
  0x68   : > { %931 = vsyncadd (%p1255_p8), [#allocation6], 4294965248  ;;  %652 = vmatprep.subr.mxu0 %v957_v0  ;;  %687 = vmatprep.subr.mxu1 %v957_v0  ;;  %v303_v4 = vld [vmem:[#allocation7 + $0x60] sm:$0xff]  ;;  %v302_v5 = vld [vmem:[#allocation7 + $0x58] sm:$0xff]  ;;  %s290_s8 = scalar_lea.vmem [#allocation8], %s1134_s13  ;;  %s494_s6 = scalar_lea.hbm %s1237_s5, %s615_s16 }
  0x69   : > { %684 = vmatprep.mubr.msk.f32.mxu0 %vm958_vm0, %v957_v0  ;;  %719 = vmatprep.mubr.msk.f32.mxu1 %vm958_vm0, %v957_v0  ;;  %v301_v6 = vld [vmem:[#allocation7 + $0x50] sm:$0xff]  ;;  %v300_v7 = vld [vmem:[#allocation7 + $0x48] sm:$0xff]  ;;  %v299_v8 = vld [vmem:[#allocation7 + $0x40] sm:$0xff]  ;;  %s496_s9 = sshll.u32 %s290_s8, 4  ;;  %s483_s11 = scalar_lea.sflag [#allocation4], %s1131_s2  ;;  %s497_s9 = int_to_ptr.vmem [resolvable:$true] %s496_s9 }
  0x6a   : > { %653 = vmatpush3.msra.mxu0 %v306_v1  ;;  %688 = vmatpush3.msra.mxu1 %v306_v1  ;;  %v298_v9 = vld [vmem:[#allocation7 + $0x38] sm:$0xff]  ;;  %v297_v10 = vld [vmem:[#allocation7 + $0x30] sm:$0xff]  ;;  %v296_v11 = vld [vmem:[#allocation7 + $0x28] sm:$0xff]  ;;  %s878_s27 = scalar_lea.vmem %s497_s9, 128  ;;  %p1256_p12 = scmp.ne.s32.totalorder %s1250_s14, 0 }
  0x6b   : > { %654 = vmatprep.subr.mxu0 %v957_v0  ;;  %689 = vmatprep.subr.mxu1 %v957_v0  ;;  %v295_v12 = vld [vmem:[#allocation7 + $0x20] sm:$0xff]  ;;  %v294_v13 = vld [vmem:[#allocation7 + $0x18] sm:$0xff]  ;;  %v293_v14 = vld [vmem:[#allocation7 + $0x10] sm:$0xff]  ;;  %p879_p3 = scmp.ne.s32.totalorder %s497_s9, %s878_s27 }
  0x6c   : > { %655 = vmatpush3.msra.mxu0 %v305_v2  ;;  %690 = vmatpush3.msra.mxu1 %v305_v2  ;;  %v292_v15 = vld [vmem:[#allocation7 + $0x8] sm:$0xff]  ;;  %v291_v16 = vld [vmem:[#allocation7] sm:$0xff]  ;;  %v308_v18 = vld [vmem:[%s255_s10] sm:$0xff] }
  0x6d   : > { %656 = vmatprep.subr.mxu0 %v957_v0  ;;  %691 = vmatprep.subr.mxu1 %v957_v0  ;;  %v307_v17 = vld [vmem:[%s246_s29] sm:$0xff]  ;;  %p880_p10 = pnand %p879_p3, %p1256_p12  ;;  %s959_s29 = smov [#allocation8]  }
  0x6e   : > { %657 = vmatpush3.msra.mxu0 %v304_v3  ;;  %692 = vmatpush3.msra.mxu1 %v304_v3  ;;  %v611_v19 = vld [vmem:[%s1235_s3] ss:$0 sm:$0xff]  ;;  %v478_v37 = vsub.f32 %v307_v17, %v308_v18  ;;  %s882_s26 = sshll.u32 %s959_s29, 4  ;;  %s883_s26 = int_to_ptr.vmem [resolvable:$false] %s882_s26 }
  0x6f   : > { %658 = vmatprep.subr.mxu0 %v957_v0  ;;  %693 = vmatprep.subr.mxu1 %v957_v0  ;;  %v612_v26 = vld [vmem:[%s1236_s4] ss:$0 sm:$0xff]  ;;  %p881_p2 = pneg %p880_p10  ;;  %s884_s22 = scalar_lea.vmem %s883_s26, 256 }
  0x70   : > { %659 = vmatpush3.msra.mxu0 %v303_v4  ;;  %694 = vmatpush3.msra.mxu1 %v303_v4  ;;  %p885_p13 = scmp.lt.s32.totalorder %s497_s9, %s883_s26  ;;  %p886_p0 = scmp.lt.s32.totalorder %s884_s22, %s878_s27 }
  0x71   : > { %660 = vmatprep.subr.mxu0 %v957_v0  ;;  %695 = vmatprep.subr.mxu1 %v957_v0 }
  0x72   : > { %661 = vmatpush3.msra.mxu0 %v302_v5  ;;  %696 = vmatpush3.msra.mxu1 %v302_v5  ;;  %p887_p5 = por %p886_p0, %p885_p13 }
  0x73   : > { %662 = vmatprep.subr.mxu0 %v957_v0  ;;  %697 = vmatprep.subr.mxu1 %v957_v0 }
  0x74   : > { %663 = vmatpush3.msra.mxu0 %v301_v6  ;;  %698 = vmatpush3.msra.mxu1 %v301_v6  ;;  %p888_p9 = pnand %p887_p5, %p881_p2 }
  0x75   : > { %664 = vmatprep.subr.mxu0 %v957_v0  ;;  %699 = vmatprep.subr.mxu1 %v957_v0 }
  0x76   : > { %665 = vmatpush3.msra.mxu0 %v300_v7  ;;  %700 = vmatpush3.msra.mxu1 %v300_v7 }
  0x77   : > { %666 = vmatprep.subr.mxu0 %v957_v0  ;;  %701 = vmatprep.subr.mxu1 %v957_v0 }
  0x78   : > { %667 = vmatpush3.msra.mxu0 %v299_v8  ;;  %702 = vmatpush3.msra.mxu1 %v299_v8 }
  0x79   : > { %668 = vmatprep.subr.mxu0 %v957_v0  ;;  %703 = vmatprep.subr.mxu1 %v957_v0 }
  0x7a   : > { %669 = vmatpush3.msra.mxu0 %v298_v9  ;;  %704 = vmatpush3.msra.mxu1 %v298_v9 }
  0x7b   : > { %670 = vmatprep.subr.mxu0 %v957_v0  ;;  %705 = vmatprep.subr.mxu1 %v957_v0 }
  0x7c   : > { %671 = vmatpush3.msra.mxu0 %v297_v10  ;;  %706 = vmatpush3.msra.mxu1 %v297_v10 }
  0x7d   : > { %672 = vmatprep.subr.mxu0 %v957_v0  ;;  %707 = vmatprep.subr.mxu1 %v957_v0 }
  0x7e   : > { %673 = vmatpush3.msra.mxu0 %v296_v11  ;;  %708 = vmatpush3.msra.mxu1 %v296_v11 }
  0x7f   : > { %674 = vmatprep.subr.mxu0 %v957_v0  ;;  %709 = vmatprep.subr.mxu1 %v957_v0 }
  0x80   : > { %675 = vmatpush3.msra.mxu0 %v295_v12  ;;  %710 = vmatpush3.msra.mxu1 %v295_v12 }
  0x81   : > { %676 = vmatprep.subr.mxu0 %v957_v0  ;;  %711 = vmatprep.subr.mxu1 %v957_v0 }
  0x82   : > { %677 = vmatpush3.msra.mxu0 %v294_v13  ;;  %712 = vmatpush3.msra.mxu1 %v294_v13 }
  0x83   : > { %678 = vmatprep.subr.mxu0 %v957_v0  ;;  %713 = vmatprep.subr.mxu1 %v957_v0 }
  0x84   : > { %679 = vmatpush3.msra.mxu0 %v293_v14  ;;  %714 = vmatpush3.msra.mxu1 %v293_v14 }
  0x85   : > { %680 = vmatprep.subr.mxu0 %v957_v0  ;;  %715 = vmatprep.subr.mxu1 %v957_v0 }
  0x86   : > { %681 = vmatpush3.msra.mxu0 %v292_v15  ;;  %716 = vmatpush3.msra.mxu1 %v292_v15 }
  0x87   : > { %682 = vmatprep.subr.mxu0 %v957_v0  ;;  %717 = vmatprep.subr.mxu1 %v957_v0 }
  0x88   : > { %683 = vmatpush3.msra.mxu0 %v291_v16  ;;  %718 = vmatpush3.msra.mxu1 %v291_v16 }
  0x89   : > { %685 = vmatmul.mubr.f32.vlgmr.msra.gmra.mxu0 %v307_v17  ;;  %720 = vmatmul.mubr.f32.vlgmr.msra.gmra.mxu1 %v308_v18 }
 0x149   : > { %v382_v20 = vpop.f32.mrf.mxu0  ;;  %v453_v21 = vpop.f32.mrf.mxu1 }
 0x14a   : > { %v383_v22 = vadd.f32 %v611_v19, %v382_v20  ;;  %v454_v23 = vadd.f32 %v611_v19, %v453_v21 }
 0x14b   : > { %v686_v24 = vpop.f32.mrf.mxu0  ;;  %v721_v25 = vpop.f32.mrf.mxu1 }
 0x14c   : > { %788 = vtanh.f32 %v383_v22 }
 0x14d   : > { %790 = vtanh.f32 %v454_v23 }
 0x159   : > { %v789_v27 = vpop.eup %788 }
 0x15a   : > { %v791_v28 = vpop.eup %790  ;;  %v465_v29 = vmul.f32 %v789_v27, %v612_v26 }
 0x15b   : > { %v468_v30 = vmul.f32 %v791_v28, %v612_v26 }
 0x15c   : > { %466 = vadd.xlane.f32.xlu0 %v465_v29 }
 0x160   : > { %469 = vadd.xlane.f32.xlu0 %v468_v30 }
 0x1e5   : > { %v467_v31 = vpop.xlane.xlu0 %466 }
 0x1e9   : > { %v470_v32 = vpop.xlane.xlu0 %469 }
 0x1ea   : > { %v471_v33 = vsub.f32 %v467_v31, %v470_v32 }
 0x1ec   : > { %v613_v34 = vmul.f32 -1.442695, %v471_v33 }
 0x1ee   : > { %792 = vpow2.f32 %v613_v34 }
 0x1fb   : > { %v793_v35 = vpop.eup %792 }
 0x1fc   : > { %v475_v36 = vadd.f32 1.0, %v793_v35 }
 0x1fe   : > { %794 = vrcp.f32 %v475_v36 }
 0x20b   : > { %v795_v38 = vpop.eup %794 }
 0x20c   : > { %v479_v39 = vmul.f32 %v795_v38, %v478_v37 }
 0x20e   : > { %v480_v40 = vadd.f32 %v479_v39, %v308_v18 }
 0x210   : > { %481 = vst [vmem:[%s290_s8] sm:$0xff] %v480_v40 }
 0x211   : > { %891 = shalt.err (!%p888_p9)
}
 0x212   : > { %s892_s13 = scalar_lea.hbm %s494_s6, 128  ;;  %s896_s10 = scalar_lea.hbm %s1237_s5, 256 }
 0x213   : > { %p893_p1 = scmp.ne.s32.totalorder %s494_s6, %s892_s13  ;;  %p897_p7 = scmp.lt.s32.totalorder %s494_s6, %s1237_s5 }
 0x214   : > { %p898_p11 = scmp.lt.s32.totalorder %s896_s10, %s892_s13 }
 0x215   : > { %p894_p4 = pnand %p893_p1, %p1256_p12 }
 0x216   : > { %p899_p8 = por %p898_p11, %p897_p7 }
 0x217   : > { %p895_p6 = pneg %p894_p4 }
 0x219   : > { %p900_p3 = pnand %p899_p8, %p895_p6 }
 0x21b   : > { %903 = shalt.err (!%p900_p3)
}
 0x21c   : > { %730 = dma.vmem_to_hbm [thread:$0]  (%p1256_p12), %s497_s9, 128, %s494_s6, %s483_s11  }
 0x21d PF: > { %s508_s23 = sand.u32 1, %s938_s18   ;;  %p1257_p10 = scmp.ne.s32.totalorder %s1244_s25, 0 }
 0x21e   : > { %p1258_p2 = scmp.ge.s32.totalorder %s950_s21, 2  ;;  %s509_s15 = scalar_lea.sflag [#allocation4], %s508_s23 }
 0x220   : > { %p744_p13 = pnand %p1258_p2, %p1257_p10 }
 0x222   : > { %p745_p0 = pneg %p744_p13 }
 0x224   : > { %933 = dma.done.wait (%p745_p0), %s509_s15, 128  }
 0x225   : > { %935 = vsyncadd (%p745_p0), %s509_s15, 4294967168  ;;  %s1259_s16 = sld [smem:[#allocation13_spill]]  ;;  %p21_p5 = scmp.ge.s32.totalorder %s1044_s30, 4  }
 0x226   : > { %s1260_s18 = smov %s942_s19  ;;  %s1261_s19 = smov %s946_s20 }
 0x227   : > { %s1263_s21 = smov %s1044_s30  ;;  %23 = sbr.rel (!%p21_p5) target bundleno = 9 (0x9), region = 102 }
 0x22b   : > { %s1262_s20 = smov %s1259_s16 }
 0x22c   :  { %514 = vsyncpa [#allocation3], 1 }
 0x22d   :  { %516 = vsyncpa [#allocation3 + $0x1], 1 }
 0x22e   :  { %517 = vsyncpa [#allocation6], 1 }
 0x22f   :  { %519 = vsyncpa [#allocation6 + $0x1], 1 }
 0x230   :  { %520 = vsyncpa [#allocation4], 1 }
 0x231   :  { %522 = vsyncpa [#allocation4 + $0x1], 1 }

</bundles_post_ra>
